<compile_context>
chip_gen: v7x
topology: tpu7x:2x2x1
jax: 0.10.0
libtpu: 0.0.40
codegen_flags: <defaults>
</compile_context>

<pallas_src>
import functools

import jax
import jax.numpy as jnp
from jax.experimental import pallas as pl
from jax.experimental.pallas import tpu as pltpu


def _mlp_kernel(x_ref, w1_ref, b1_ref, w2_ref, b2_ref, w3_ref, b3_ref, o_ref, *, lane_dense):
    # All three matmuls + biases + ReLUs fused per batch tile.
    # Matmul operands are bf16 (native MXU dtype on v5e/v6e/v7x); accumulate in f32 on the MXU.
    # Bias add / ReLU stay in f32 on the VPU (v5e has no bf16 VPU), cast back to bf16 only at
    # each MXU boundary.
    x = x_ref[...]
    h = jnp.dot(x, w1_ref[...], preferred_element_type=jnp.float32)
    h = jnp.maximum(h + b1_ref[...], 0.0)
    h = jnp.dot(h.astype(w2_ref.dtype), w2_ref[...], preferred_element_type=jnp.float32)
    h = jnp.maximum(h + b2_ref[...], 0.0)
    out = jnp.dot(h.astype(w3_ref.dtype), w3_ref[...], preferred_element_type=jnp.float32)
    out = (out + b3_ref[...]).astype(o_ref.dtype)
    if lane_dense:
        # (rows, out_dim) row-major is bit-identical to (rows*out_dim/128, 128): present a
        # lane-dense tile to the store/writeback path instead of masked 16-wide stores.
        out = out.reshape(o_ref.shape)
    o_ref[...] = out


def _pick_block_rows(batch, requested):
    """Batch tile: ~512 rows (MXU-friendly, small VMEM), multiple of 8, divides batch.
    For batch > 512 this yields a multi-step grid so the DMA pipeline runs and v7x can shard
    the 'parallel' axis across its 2 TensorCores."""
    if requested is None:
        if batch <= 512:
            requested = batch  # too few rows to split profitably
        else:
            cand = 512
            while cand >= 8 and batch % cand:
                cand -= 8
            requested = cand if cand >= 8 else batch
    assert batch % requested == 0, "block_rows must divide batch"
    if requested < batch:
        assert requested % 8 == 0, "block_rows must be a multiple of 8 (sublane) when tiling"
    return requested


def fully_connected_net(x, params, *, block_rows=None, use_bf16=True, lane_dense=True):
    """x: (B, input_dim). params: dict of w1,b1,w2,b2,w3,b3 with weights stored (in, out)."""
    batch, in_dim = x.shape
    h1 = params["w1"].shape[1]
    h2 = params["w2"].shape[1]
    out_dim = params["w3"].shape[1]
    out_dtype = x.dtype

    block_rows = _pick_block_rows(batch, block_rows)
    num_blocks = batch // block_rows

    # Cast matmul operands to bf16 at the call boundary; keep biases in f32.
    mm_dtype = jnp.bfloat16 if use_bf16 else x.dtype
    xc = x.astype(mm_dtype)
    w1 = params["w1"].astype(mm_dtype)
    w2 = params["w2"].astype(mm_dtype)
    w3 = params["w3"].astype(mm_dtype)
    b1 = params["b1"].astype(jnp.float32)
    b2 = params["b2"].astype(jnp.float32)
    b3 = params["b3"].astype(jnp.float32)

    # Lane-dense output is only expressible when the row-major bits line up per tile.
    dense_ok = (
        lane_dense
        and out_dim < 128
        and (block_rows * out_dim) % 128 == 0
        and (num_blocks == 1 or ((block_rows * out_dim) // 128) % 8 == 0)
    )

    # Advisory cost estimate so XLA schedules neighbors sensibly around the custom call.
    mm_bytes = jnp.dtype(mm_dtype).itemsize
    flops = 2 * batch * (in_dim * h1 + h1 * h2 + h2 * out_dim)
    bytes_accessed = (
        batch * in_dim * mm_bytes
        + (in_dim * h1 + h1 * h2 + h2 * out_dim) * mm_bytes
        + (h1 + h2 + out_dim) * 4
        + batch * out_dim * jnp.dtype(out_dtype).itemsize
    )
    cost = pl.CostEstimate(flops=flops, transcendentals=0, bytes_accessed=bytes_accessed)

    # x tile spec: deeper pipelining only pays when the grid is long enough to hide DMA.
    if num_blocks >= 4:
        x_spec = pl.BlockSpec((block_rows, in_dim), lambda i: (i, 0),
                              pipeline_mode=pl.Buffered(3))
    else:
        x_spec = pl.BlockSpec((block_rows, in_dim), lambda i: (i, 0))

    full = lambda shape: pl.BlockSpec(shape, lambda i: (0, 0))  # weights/biases stay resident
    in_specs = [
        x_spec,
        full((in_dim, h1)), full((1, h1)),
        full((h1, h2)), full((1, h2)),
        full((h2, out_dim)), full((1, out_dim)),
    ]

    compiler_params = pltpu.CompilerParams(
        dimension_semantics=("parallel",),
        # Explicit scoped-VMEM limit: 32 MiB is safe on every generation (v7x has only 64 MiB
        # physical per TC) and well above what a <=512-row bf16 tile + resident weights need.
        vmem_limit_bytes=32 * 1024 * 1024,
    )

    def run(dense):
        if dense:
            blk_rows_out = (block_rows * out_dim) // 128
            out_shape = jax.ShapeDtypeStruct(((batch * out_dim) // 128, 128), out_dtype)
            out_spec = pl.BlockSpec((blk_rows_out, 128), lambda i: (i, 0))
        else:
            out_shape = jax.ShapeDtypeStruct((batch, out_dim), out_dtype)
            out_spec = pl.BlockSpec((block_rows, out_dim), lambda i: (i, 0))

        kernel = functools.partial(_mlp_kernel, lane_dense=dense)
        out = pl.pallas_call(
            kernel,
            out_shape=out_shape,
            grid_spec=pltpu.PrefetchScalarGridSpec(
                num_scalar_prefetch=0,
                grid=(num_blocks,),
                in_specs=in_specs,
                out_specs=out_spec,
            ),
            compiler_params=compiler_params,
            cost_estimate=cost,
        )(xc, w1, b1, w2, b2, w3, b3)
        if dense:
            out = out.reshape(batch, out_dim)  # bit-identical row-major view back to (B, out_dim)
        return out

    if dense_ok:
        try:
            out = run(True)
            jax.block_until_ready(out)
            return out
        except Exception:
            # Mosaic may reject the in-kernel (rows, out_dim)->(rows*out_dim/128, 128) relayout
            # on some generations; fall back to the natural (masked-store) output layout.
            pass
    return run(False)


def init_params(key, input_dim, output_dim, dtype=jnp.float32):
    """Deterministic init mimicking PyTorch nn.Linear default (uniform +/- 1/sqrt(fan_in)).
    Weights are stored as (in_features, out_features) == PyTorch weight.T."""
    dims = [(input_dim, 256), (256, 128), (128, output_dim)]
    params = {}
    for idx, (fan_in, fan_out) in enumerate(dims, start=1):
        key, kw, kb = jax.random.split(key, 3)
        bound = 1.0 / (fan_in ** 0.5)
        params[f"w{idx}"] = jax.random.uniform(
            kw, (fan_in, fan_out), dtype=dtype, minval=-bound, maxval=bound)
        params[f"b{idx}"] = jax.random.uniform(
            kb, (1, fan_out), dtype=dtype, minval=-bound, maxval=bound)
    return params


def reference_forward(x, params):
    h = jnp.maximum(x @ params["w1"] + params["b1"], 0.0)
    h = jnp.maximum(h @ params["w2"] + params["b2"], 0.0)
    return h @ params["w3"] + params["b3"]


if __name__ == "__main__":
    key = jax.random.PRNGKey(0)
    batch, input_dim, output_dim = 8, 64, 16

    key, kx = jax.random.split(key)
    x = jax.random.normal(kx, (batch, input_dim), dtype=jnp.float32)
    params = init_params(key, input_dim, output_dim)

    out = fully_connected_net(x, params)
    out = jax.block_until_ready(out)

    ref = reference_forward(x, params)
    assert out.shape == (batch, output_dim)
    # bf16 matmul operands with f32 accumulation: compare against the f32 reference with a
    # correspondingly loosened tolerance.
    assert jnp.allclose(out, ref, atol=3e-2, rtol=3e-2), "mismatch vs f32 reference"

    print("KERNEL_OK")
</pallas_src>

<mosaic_0001>
module attributes {stable_mosaic.version = 11 : i64} {
  func.func @_mlp_kernel(%arg0: i32, %arg1: memref<8x64xbf16, #tpu.memory_space<vmem>>, %arg2: memref<64x256xbf16, #tpu.memory_space<vmem>>, %arg3: memref<1x256xf32, #tpu.memory_space<vmem>>, %arg4: memref<256x128xbf16, #tpu.memory_space<vmem>>, %arg5: memref<1x128xf32, #tpu.memory_space<vmem>>, %arg6: memref<128x16xbf16, #tpu.memory_space<vmem>>, %arg7: memref<1x16xf32, #tpu.memory_space<vmem>>, %arg8: memref<1x128xf32, #tpu.memory_space<vmem>>) attributes {dimension_semantics = [#tpu.dimension_semantics<parallel>], iteration_bounds = array<i64: 1>, scalar_prefetch = 0 : i64, scratch_operands = 0 : i64, tpu.core_type = #tpu.core_type<tc>, window_params = [{transform_indices = @transform_0, window_bounds = array<i64: 8, 64>}, {pipeline_mode = #tpu.pipeline_mode<synchronous>, transform_indices = @transform_1, window_bounds = array<i64: 64, 256>}, {pipeline_mode = #tpu.pipeline_mode<synchronous>, transform_indices = @transform_2, window_bounds = array<i64: 1, 256>}, {pipeline_mode = #tpu.pipeline_mode<synchronous>, transform_indices = @transform_3, window_bounds = array<i64: 256, 128>}, {pipeline_mode = #tpu.pipeline_mode<synchronous>, transform_indices = @transform_4, window_bounds = array<i64: 1, 128>}, {pipeline_mode = #tpu.pipeline_mode<synchronous>, transform_indices = @transform_5, window_bounds = array<i64: 128, 16>}, {pipeline_mode = #tpu.pipeline_mode<synchronous>, transform_indices = @transform_6, window_bounds = array<i64: 1, 16>}, {transform_indices = @transform_7, window_bounds = array<i64: 1, 128>}]} {
    %c0 = arith.constant 0 : index
    %c0_0 = arith.constant 0 : index
    %0 = vector.load %arg1[%c0, %c0_0] : memref<8x64xbf16, #tpu.memory_space<vmem>>, vector<8x64xbf16>
    %c0_1 = arith.constant 0 : index
    %c0_2 = arith.constant 0 : index
    %1 = vector.load %arg2[%c0_1, %c0_2] : memref<64x256xbf16, #tpu.memory_space<vmem>>, vector<64x256xbf16>
    %cst = arith.constant dense<0.000000e+00> : vector<8x256xf32>
    %2 = tpu.matmul %0, %1, %cst {dimension_numbers = #tpu.dot_dimension_numbers<[1], [0], [0], [1], [0, 0, 1, 1], [], []>} : vector<8x64xbf16>, vector<64x256xbf16>, vector<8x256xf32> -> vector<8x256xf32>
    %c0_3 = arith.constant 0 : index
    %c0_4 = arith.constant 0 : index
    %3 = vector.load %arg3[%c0_3, %c0_4] : memref<1x256xf32, #tpu.memory_space<vmem>>, vector<1x256xf32>
    %4 = vector.broadcast %3 : vector<1x256xf32> to vector<8x256xf32>
    %5 = arith.addf %2, %4 : vector<8x256xf32>
    %cst_5 = arith.constant 0.000000e+00 : f32
    %6 = vector.broadcast %cst_5 : f32 to vector<8x256xf32>
    %7 = arith.maximumf %5, %6 : vector<8x256xf32>
    %8 = arith.truncf %7 : vector<8x256xf32> to vector<8x256xbf16>
    %c0_6 = arith.constant 0 : index
    %c0_7 = arith.constant 0 : index
    %9 = vector.load %arg4[%c0_6, %c0_7] : memref<256x128xbf16, #tpu.memory_space<vmem>>, vector<256x128xbf16>
    %cst_8 = arith.constant dense<0.000000e+00> : vector<8x128xf32>
    %10 = tpu.matmul %8, %9, %cst_8 {dimension_numbers = #tpu.dot_dimension_numbers<[1], [0], [0], [1], [0, 0, 1, 1], [], []>} : vector<8x256xbf16>, vector<256x128xbf16>, vector<8x128xf32> -> vector<8x128xf32>
    %c0_9 = arith.constant 0 : index
    %c0_10 = arith.constant 0 : index
    %11 = vector.load %arg5[%c0_9, %c0_10] : memref<1x128xf32, #tpu.memory_space<vmem>>, vector<1x128xf32>
    %12 = vector.broadcast %11 : vector<1x128xf32> to vector<8x128xf32>
    %13 = arith.addf %10, %12 : vector<8x128xf32>
    %cst_11 = arith.constant 0.000000e+00 : f32
    %14 = vector.broadcast %cst_11 : f32 to vector<8x128xf32>
    %15 = arith.maximumf %13, %14 : vector<8x128xf32>
    %16 = arith.truncf %15 : vector<8x128xf32> to vector<8x128xbf16>
    %c0_12 = arith.constant 0 : index
    %c0_13 = arith.constant 0 : index
    %17 = vector.load %arg6[%c0_12, %c0_13] : memref<128x16xbf16, #tpu.memory_space<vmem>>, vector<128x16xbf16>
    %cst_14 = arith.constant dense<0.000000e+00> : vector<8x16xf32>
    %18 = tpu.matmul %16, %17, %cst_14 {dimension_numbers = #tpu.dot_dimension_numbers<[1], [0], [0], [1], [0, 0, 1, 1], [], []>} : vector<8x128xbf16>, vector<128x16xbf16>, vector<8x16xf32> -> vector<8x16xf32>
    %c0_15 = arith.constant 0 : index
    %c0_16 = arith.constant 0 : index
    %19 = vector.load %arg7[%c0_15, %c0_16] : memref<1x16xf32, #tpu.memory_space<vmem>>, vector<1x16xf32>
    %20 = vector.broadcast %19 : vector<1x16xf32> to vector<8x16xf32>
    %21 = arith.addf %18, %20 : vector<8x16xf32>
    %22 = vector.shape_cast %21 : vector<8x16xf32> to vector<1x128xf32>
    %c0_17 = arith.constant 0 : index
    %c0_18 = arith.constant 0 : index
    %23 = vector.load %arg8[%c0_17, %c0_18] : memref<1x128xf32, #tpu.memory_space<vmem>>, vector<1x128xf32>
    tpu.vector_store %arg8[%c0_17, %c0_18], %22 {strides = array<i32>} : memref<1x128xf32, #tpu.memory_space<vmem>>, vector<1x128xf32>,
    return
  }
  func.func @transform_0(%arg0: i32) -> (i32, i32) {
    %c0_i32 = arith.constant 0 : i32
    %c0_i32_0 = arith.constant 0 : i32
    return %arg0, %c0_i32 : i32, i32
  }
  func.func @transform_1(%arg0: i32) -> (i32, i32) {
    %c0_i32 = arith.constant 0 : i32
    %c0_i32_0 = arith.constant 0 : i32
    %c0_i32_1 = arith.constant 0 : i32
    return %c0_i32, %c0_i32_0 : i32, i32
  }
  func.func @transform_2(%arg0: i32) -> (i32, i32) {
    %c0_i32 = arith.constant 0 : i32
    %c0_i32_0 = arith.constant 0 : i32
    %c0_i32_1 = arith.constant 0 : i32
    return %c0_i32, %c0_i32_0 : i32, i32
  }
  func.func @transform_3(%arg0: i32) -> (i32, i32) {
    %c0_i32 = arith.constant 0 : i32
    %c0_i32_0 = arith.constant 0 : i32
    %c0_i32_1 = arith.constant 0 : i32
    return %c0_i32, %c0_i32_0 : i32, i32
  }
  func.func @transform_4(%arg0: i32) -> (i32, i32) {
    %c0_i32 = arith.constant 0 : i32
    %c0_i32_0 = arith.constant 0 : i32
    %c0_i32_1 = arith.constant 0 : i32
    return %c0_i32, %c0_i32_0 : i32, i32
  }
  func.func @transform_5(%arg0: i32) -> (i32, i32) {
    %c0_i32 = arith.constant 0 : i32
    %c0_i32_0 = arith.constant 0 : i32
    %c0_i32_1 = arith.constant 0 : i32
    return %c0_i32, %c0_i32_0 : i32, i32
  }
  func.func @transform_6(%arg0: i32) -> (i32, i32) {
    %c0_i32 = arith.constant 0 : i32
    %c0_i32_0 = arith.constant 0 : i32
    %c0_i32_1 = arith.constant 0 : i32
    return %c0_i32, %c0_i32_0 : i32, i32
  }
  func.func @transform_7(%arg0: i32) -> (i32, i32) {
    %c0_i32 = arith.constant 0 : i32
    %c0_i32_0 = arith.constant 0 : i32
    return %arg0, %c0_i32 : i32, i32
  }
}

module attributes {stable_mosaic.version = 11 : i64} {
  func.func @_mlp_kernel(%arg0: i32, %arg1: memref<8x64xbf16, #tpu.memory_space<vmem>>, %arg2: memref<64x256xbf16, #tpu.memory_space<vmem>>, %arg3: memref<1x256xf32, #tpu.memory_space<vmem>>, %arg4: memref<256x128xbf16, #tpu.memory_space<vmem>>, %arg5: memref<1x128xf32, #tpu.memory_space<vmem>>, %arg6: memref<128x16xbf16, #tpu.memory_space<vmem>>, %arg7: memref<1x16xf32, #tpu.memory_space<vmem>>, %arg8: memref<8x16xf32, #tpu.memory_space<vmem>>) attributes {dimension_semantics = [#tpu.dimension_semantics<parallel>], iteration_bounds = array<i64: 1>, scalar_prefetch = 0 : i64, scratch_operands = 0 : i64, tpu.core_type = #tpu.core_type<tc>, window_params = [{transform_indices = @transform_0, window_bounds = array<i64: 8, 64>}, {pipeline_mode = #tpu.pipeline_mode<synchronous>, transform_indices = @transform_1, window_bounds = array<i64: 64, 256>}, {pipeline_mode = #tpu.pipeline_mode<synchronous>, transform_indices = @transform_2, window_bounds = array<i64: 1, 256>}, {pipeline_mode = #tpu.pipeline_mode<synchronous>, transform_indices = @transform_3, window_bounds = array<i64: 256, 128>}, {pipeline_mode = #tpu.pipeline_mode<synchronous>, transform_indices = @transform_4, window_bounds = array<i64: 1, 128>}, {pipeline_mode = #tpu.pipeline_mode<synchronous>, transform_indices = @transform_5, window_bounds = array<i64: 128, 16>}, {pipeline_mode = #tpu.pipeline_mode<synchronous>, transform_indices = @transform_6, window_bounds = array<i64: 1, 16>}, {transform_indices = @transform_7, window_bounds = array<i64: 8, 16>}]} {
    %c0 = arith.constant 0 : index
    %c0_0 = arith.constant 0 : index
    %0 = vector.load %arg1[%c0, %c0_0] : memref<8x64xbf16, #tpu.memory_space<vmem>>, vector<8x64xbf16>
    %c0_1 = arith.constant 0 : index
    %c0_2 = arith.constant 0 : index
    %1 = vector.load %arg2[%c0_1, %c0_2] : memref<64x256xbf16, #tpu.memory_space<vmem>>, vector<64x256xbf16>
    %cst = arith.constant dense<0.000000e+00> : vector<8x256xf32>
    %2 = tpu.matmul %0, %1, %cst {dimension_numbers = #tpu.dot_dimension_numbers<[1], [0], [0], [1], [0, 0, 1, 1], [], []>} : vector<8x64xbf16>, vector<64x256xbf16>, vector<8x256xf32> -> vector<8x256xf32>
    %c0_3 = arith.constant 0 : index
    %c0_4 = arith.constant 0 : index
    %3 = vector.load %arg3[%c0_3, %c0_4] : memref<1x256xf32, #tpu.memory_space<vmem>>, vector<1x256xf32>
    %4 = vector.broadcast %3 : vector<1x256xf32> to vector<8x256xf32>
    %5 = arith.addf %2, %4 : vector<8x256xf32>
    %cst_5 = arith.constant 0.000000e+00 : f32
    %6 = vector.broadcast %cst_5 : f32 to vector<8x256xf32>
    %7 = arith.maximumf %5, %6 : vector<8x256xf32>
    %8 = arith.truncf %7 : vector<8x256xf32> to vector<8x256xbf16>
    %c0_6 = arith.constant 0 : index
    %c0_7 = arith.constant 0 : index
    %9 = vector.load %arg4[%c0_6, %c0_7] : memref<256x128xbf16, #tpu.memory_space<vmem>>, vector<256x128xbf16>
    %cst_8 = arith.constant dense<0.000000e+00> : vector<8x128xf32>
    %10 = tpu.matmul %8, %9, %cst_8 {dimension_numbers = #tpu.dot_dimension_numbers<[1], [0], [0], [1], [0, 0, 1, 1], [], []>} : vector<8x256xbf16>, vector<256x128xbf16>, vector<8x128xf32> -> vector<8x128xf32>
    %c0_9 = arith.constant 0 : index
    %c0_10 = arith.constant 0 : index
    %11 = vector.load %arg5[%c0_9, %c0_10] : memref<1x128xf32, #tpu.memory_space<vmem>>, vector<1x128xf32>
    %12 = vector.broadcast %11 : vector<1x128xf32> to vector<8x128xf32>
    %13 = arith.addf %10, %12 : vector<8x128xf32>
    %cst_11 = arith.constant 0.000000e+00 : f32
    %14 = vector.broadcast %cst_11 : f32 to vector<8x128xf32>
    %15 = arith.maximumf %13, %14 : vector<8x128xf32>
    %16 = arith.truncf %15 : vector<8x128xf32> to vector<8x128xbf16>
    %c0_12 = arith.constant 0 : index
    %c0_13 = arith.constant 0 : index
    %17 = vector.load %arg6[%c0_12, %c0_13] : memref<128x16xbf16, #tpu.memory_space<vmem>>, vector<128x16xbf16>
    %cst_14 = arith.constant dense<0.000000e+00> : vector<8x16xf32>
    %18 = tpu.matmul %16, %17, %cst_14 {dimension_numbers = #tpu.dot_dimension_numbers<[1], [0], [0], [1], [0, 0, 1, 1], [], []>} : vector<8x128xbf16>, vector<128x16xbf16>, vector<8x16xf32> -> vector<8x16xf32>
    %c0_15 = arith.constant 0 : index
    %c0_16 = arith.constant 0 : index
    %19 = vector.load %arg7[%c0_15, %c0_16] : memref<1x16xf32, #tpu.memory_space<vmem>>, vector<1x16xf32>
    %20 = vector.broadcast %19 : vector<1x16xf32> to vector<8x16xf32>
    %21 = arith.addf %18, %20 : vector<8x16xf32>
    %c0_17 = arith.constant 0 : index
    %c0_18 = arith.constant 0 : index
    %22 = vector.load %arg8[%c0_17, %c0_18] : memref<8x16xf32, #tpu.memory_space<vmem>>, vector<8x16xf32>
    tpu.vector_store %arg8[%c0_17, %c0_18], %21 {strides = array<i32>} : memref<8x16xf32, #tpu.memory_space<vmem>>, vector<8x16xf32>,
    return
  }
  func.func @transform_0(%arg0: i32) -> (i32, i32) {
    %c0_i32 = arith.constant 0 : i32
    %c0_i32_0 = arith.constant 0 : i32
    return %arg0, %c0_i32 : i32, i32
  }
  func.func @transform_1(%arg0: i32) -> (i32, i32) {
    %c0_i32 = arith.constant 0 : i32
    %c0_i32_0 = arith.constant 0 : i32
    %c0_i32_1 = arith.constant 0 : i32
    return %c0_i32, %c0_i32_0 : i32, i32
  }
  func.func @transform_2(%arg0: i32) -> (i32, i32) {
    %c0_i32 = arith.constant 0 : i32
    %c0_i32_0 = arith.constant 0 : i32
    %c0_i32_1 = arith.constant 0 : i32
    return %c0_i32, %c0_i32_0 : i32, i32
  }
  func.func @transform_3(%arg0: i32) -> (i32, i32) {
    %c0_i32 = arith.constant 0 : i32
    %c0_i32_0 = arith.constant 0 : i32
    %c0_i32_1 = arith.constant 0 : i32
    return %c0_i32, %c0_i32_0 : i32, i32
  }
  func.func @transform_4(%arg0: i32) -> (i32, i32) {
    %c0_i32 = arith.constant 0 : i32
    %c0_i32_0 = arith.constant 0 : i32
    %c0_i32_1 = arith.constant 0 : i32
    return %c0_i32, %c0_i32_0 : i32, i32
  }
  func.func @transform_5(%arg0: i32) -> (i32, i32) {
    %c0_i32 = arith.constant 0 : i32
    %c0_i32_0 = arith.constant 0 : i32
    %c0_i32_1 = arith.constant 0 : i32
    return %c0_i32, %c0_i32_0 : i32, i32
  }
  func.func @transform_6(%arg0: i32) -> (i32, i32) {
    %c0_i32 = arith.constant 0 : i32
    %c0_i32_0 = arith.constant 0 : i32
    %c0_i32_1 = arith.constant 0 : i32
    return %c0_i32, %c0_i32_0 : i32, i32
  }
  func.func @transform_7(%arg0: i32) -> (i32, i32) {
    %c0_i32 = arith.constant 0 : i32
    %c0_i32_0 = arith.constant 0 : i32
    return %arg0, %c0_i32 : i32, i32
  }
}

</mosaic_0001>

<bundles_post_ra>
// kernel: tpu_custom_call.1
= control target key start
LH: loop header
LB: loop body
LE: loop exit
PB: predicated region body
PF: predicated region fallthrough
CT: control target
= control target key end

     0   :  { %12 = vsyncpa [#allocation3], 0  ;;  %s765_s0 = inlined_call_operand.vmem [shape: bf16[8,64], index: 0, kind: input, shape index: {}]   ;;  %s766_s1 = inlined_call_operand.vmem [shape: bf16[64,256], index: 1, kind: input, shape index: {}]   ;;  %s767_s2 = inlined_call_operand.vmem [shape: f32[1,256], index: 2, kind: input, shape index: {}]   ;;  %s768_s3 = inlined_call_operand.hbm [shape: bf16[256,128], index: 3, kind: input, shape index: {}]   ;;  %s769_s4 = inlined_call_operand.vmem [shape: f32[1,128], index: 4, kind: input, shape index: {}]   ;;  %s770_s5 = inlined_call_operand.vmem [shape: bf16[128,16], index: 5, kind: input, shape index: {}]   ;;  %s771_s6 = inlined_call_operand.vmem [shape: f32[1,16], index: 6, kind: input, shape index: {}]   ;;  %s772_s7 = inlined_call_operand.hbm [shape: f32[8,16], index: 7, kind: output, shape index: {}]  }
   0x1   :  { %13 = vsyncpa [#allocation4], 0  ;;  %s634_s24 = smov [#allocation2]   ;;  %s586_s28 = scalar_lea.hbm %s768_s3, 2048 }
   0x2   :  { %s25_s25 = sshll.u32 %s634_s24, 4  ;;  %p587_p0 = scmp.ne.s32.totalorder %s768_s3, %s586_s28  ;;  %s26_s25 = int_to_ptr.vmem [resolvable:$true] %s25_s25 }
   0x3   :  { %p590_p1 = scmp.lt.u32.totalorder %s586_s28, %s768_s3 }
   0x5   :  { %p592_p2 = pnand %p590_p1, %p587_p0 }
   0x7   :  { %595 = shalt.err (!%p592_p2)
}
   0x8   :  { %s596_s10 = scalar_lea.vmem %s26_s25, 2048  ;;  %p601_p4 = scmp.lt.s32.totalorder %s26_s25, %s26_s25 }
   0x9   :  { %p597_p3 = scmp.ne.s32.totalorder %s26_s25, %s596_s10  ;;  %p602_p5 = scmp.lt.s32.totalorder %s596_s10, %s596_s10 }
   0xb   :  { %p603_p6 = por %p602_p5, %p601_p4 }
   0xd   :  { %p604_p7 = pnand %p603_p6, %p597_p3 }
   0xf   :  { %607 = shalt.err (!%p604_p7)
}
  0x10   :  { %s635_s11 = smov 64   ;;  %s636_s12 = smov 4  }
  0x11   :  { %31 = dma.hbm_to_vmem [thread:$0]  %s768_s3, 2048, %s26_s25, [#allocation3], %s635_s11, %s635_s11, %s636_s12  }
  0x12   :  { %630 = dma.done.wait [#allocation3], 2048  }
  0x13   :  { %631 = vsyncadd [#allocation3], 4294965248  ;;  %v637_v0 = vmov 0   ;;  %v550_v1 = vld [vmem:[%s766_s1 + $0x4] ss:$8 sps:$4 sm:$0xff]   ;;  %v566_v12 = vld [vmem:[#allocation2 + $0x50] sm:$0xff]   ;;  %v53_v33 = vlaneseq }
  0x14   :  { %139 = vmatprep.mubr.bf16.mxu0 %v637_v0  ;;  %v552_v2 = vld [vmem:[%s766_s1] ss:$8 sps:$4 sm:$0xff]   ;;  %107 = vmatprep.subr.bf16.mxu0 %v550_v1  ;;  %v553_v3 = vld [vmem:[%s766_s1 + $0x14] ss:$8 sps:$4 sm:$0xff]   ;;  %v555_v4 = vld [vmem:[%s766_s1 + $0x10] ss:$8 sps:$4 sm:$0xff]  }
  0x15   :  { %108 = vmatpush1.bf16.msra.mxu0 %v552_v2  ;;  %v556_v5 = vld [vmem:[%s766_s1 + $0x24] ss:$8 sps:$4 sm:$0xff]   ;;  %v558_v6 = vld [vmem:[%s766_s1 + $0x20] ss:$8 sps:$4 sm:$0xff]   ;;  %v559_v7 = vld [vmem:[%s766_s1 + $0x34] ss:$8 sps:$4 sm:$0xff]  }
  0x16   :  { %109 = vmatprep.subr.bf16.mxu0 %v553_v3  ;;  %v562_v8 = vld [vmem:[#allocation2 + $0x40] sm:$0xff]   ;;  %v564_v10 = vld [vmem:[#allocation2 + $0x48] sm:$0xff]   ;;  %v561_v13 = vld [vmem:[%s766_s1 + $0x30] ss:$8 sps:$4 sm:$0xff]   ;;  %vm103_vm0 = vcmask 523264   ;;  %v638_v27 = vmov 0.0  }
  0x17   :  { %v563_v9 = vld [vmem:[#allocation2] sm:$0xff]   ;;  %492 = vmatprep.subr.bf16.mxu1 %v562_v8  ;;  %v565_v11 = vld [vmem:[#allocation2 + $0x8] sm:$0xff]   ;;  %v567_v14 = vld [vmem:[#allocation2 + $0x10] sm:$0xff]   ;;  %v54_v34 = vshrl.u32 %v53_v33, 7  ;;  %vm639_vm1 = vmmov 0   ;;  %vm440_vm2 = vcmask 130048  }
  0x18   :  { %493 = vmatpush3.bf16.msra.mxu1 %v563_v9  ;;  %v568_v15 = vld [vmem:[#allocation2 + $0x58] sm:$0xff]   ;;  %v42_v16 = vld [vmem:[%s765_s0] sm:$0xf]  ;;  %v572_v20 = vld [vmem:[#allocation2 + $0x68] sm:$0xff]  }
  0x19   :  { %110 = vmatpush1.bf16.msra.mxu0 %v555_v4  ;;  %494 = vmatprep.subr.bf16.mxu1 %v564_v10  ;;  %v569_v17 = vld [vmem:[#allocation2 + $0x18] sm:$0xff]   ;;  %v570_v18 = vld [vmem:[#allocation2 + $0x60] sm:$0xff]   ;;  %v573_v21 = vld [vmem:[#allocation2 + $0x28] sm:$0xff]   ;;  %v55_v35 = vsub.s32 0, %v54_v34  ;;  %v59_v37 = vsub.s32 1, %v54_v34 }
  0x1a   :  { %111 = vmatprep.subr.bf16.mxu0 %v556_v5  ;;  %v571_v19 = vld [vmem:[#allocation2 + $0x20] sm:$0xff]   ;;  %v574_v22 = vld [vmem:[#allocation2 + $0x70] sm:$0xff]   ;;  %v576_v24 = vld [vmem:[#allocation2 + $0x78] sm:$0xff]  }
  0x1b   :  { %v575_v23 = vld [vmem:[#allocation2 + $0x30] sm:$0xff]   ;;  %v577_v25 = vld [vmem:[#allocation2 + $0x38] sm:$0xff]   ;;  %v578_v26 = vld [vmem:[%s770_s5] sm:$0xff]  }
  0x1c   :  { %495 = vmatpush3.bf16.msra.mxu1 %v565_v11  ;;  %v579_v28 = vld [vmem:[%s770_s5 + $0x8] sm:$0xff]   ;;  %v580_v29 = vld [vmem:[%s770_s5 + $0x10] sm:$0xff]   ;;  %v581_v30 = vld [vmem:[%s770_s5 + $0x18] sm:$0xff]  }
  0x1d   :  { %112 = vmatpush1.bf16.msra.mxu0 %v558_v6  ;;  %496 = vmatprep.subr.bf16.mxu1 %v566_v12  ;;  %v582_v31 = vld [vmem:[%s770_s5 + $0x20] sm:$0xff]   ;;  %v583_v32 = vld [vmem:[%s770_s5 + $0x28] sm:$0xff]   ;;  %v584_v50 = vld [vmem:[%s770_s5 + $0x30] sm:$0xff]  }
  0x1e   :  { %113 = vmatprep.subr.bf16.mxu0 %v559_v7  ;;  %v51_v36 = vld [vmem:[%s767_s2] sm:$0x3]  ;;  %v585_v51 = vld [vmem:[%s770_s5 + $0x38] sm:$0xff]   ;;  %s640_s5 = smov [#allocation5]  }
  0x1f   :  { %v56_v38 = vrot.slane %v51_v36, %v55_v35  ;;  %v60_v39 = vrot.slane %v51_v36, %v59_v37  ;;  %v466_v53 = vld [vmem:[%s769_s4] ss:$0 sm:$0xff]  ;;  %s448_s27 = sshll.u32 %s640_s5, 4  ;;  %s449_s27 = int_to_ptr.vmem [resolvable:$true] %s448_s27 }
  0x20   :  { %497 = vmatpush3.bf16.msra.mxu1 %v567_v14  ;;  %v483_v61 = vld [vmem:[%s771_s6] ss:$0 sm:$0xff]  ;;  %s608_s4 = scalar_lea.vmem %s449_s27, 128  ;;  %p613_p9 = scmp.lt.s32.totalorder %s449_s27, %s449_s27 }
  0x21   :  { %114 = vmatpush1.bf16.msra.mxu0 %v561_v13  ;;  %498 = vmatprep.subr.bf16.mxu1 %v568_v15  ;;  %p609_p8 = scmp.ne.s32.totalorder %s449_s27, %s608_s4  ;;  %p614_p10 = scmp.lt.s32.totalorder %s608_s4, %s608_s4 }
  0x22   :  { %523 = vmatprep.subr.bf16.mxu0 %v638_v27 }
  0x23   :  { %p615_p11 = por %p614_p10, %p613_p9 }
  0x24   :  { %465 = vmatmul.mubr.msk.bf16.vlgmr.msra.gmra.mrb[0].mxu0 %vm103_vm0, %v42_v16  ;;  %499 = vmatpush3.bf16.msra.mxu1 %v569_v17 }
  0x25   :  { %500 = vmatprep.subr.bf16.mxu1 %v570_v18  ;;  %524 = vmatpush3.bf16.msra.mxu0 %v578_v26  ;;  %p616_p12 = pnand %p615_p11, %p609_p8 }
  0x26   :  { %525 = vmatprep.subr.bf16.mxu0 %v638_v27  ;;  %539 = vmatprep.mubr.msk.bf16.mxu0 %vm639_vm1, %v638_v27 }
  0x28   :  { %501 = vmatpush3.bf16.msra.mxu1 %v571_v19 }
  0x29   :  { %502 = vmatprep.subr.bf16.mxu1 %v572_v20  ;;  %526 = vmatpush3.bf16.msra.mxu0 %v579_v28 }
  0x2a   :  { %527 = vmatprep.subr.bf16.mxu0 %v638_v27 }
  0x2c   :  { %503 = vmatpush3.bf16.msra.mxu1 %v573_v21 }
  0x2d   :  { %504 = vmatprep.subr.bf16.mxu1 %v574_v22  ;;  %528 = vmatpush3.bf16.msra.mxu0 %v580_v29 }
  0x2e   :  { %529 = vmatprep.subr.bf16.mxu0 %v638_v27 }
  0x30   :  { %505 = vmatpush3.bf16.msra.mxu1 %v575_v23 }
  0x31   :  { %506 = vmatprep.subr.bf16.mxu1 %v576_v24  ;;  %530 = vmatpush3.bf16.msra.mxu0 %v581_v30 }
  0x32   :  { %531 = vmatprep.subr.bf16.mxu0 %v638_v27 }
  0x34   :  { %507 = vmatpush3.bf16.msra.mxu1 %v577_v25 }
  0x35   :  { %532 = vmatpush3.bf16.msra.mxu0 %v582_v31 }
  0x36   :  { %533 = vmatprep.subr.bf16.mxu0 %v638_v27 }
  0x39   :  { %534 = vmatpush3.bf16.msra.mxu0 %v583_v32 }
  0x3a   :  { %535 = vmatprep.subr.bf16.mxu0 %v638_v27 }
  0x3d   :  { %536 = vmatpush3.bf16.msra.mxu0 %v584_v50 }
  0x3e   :  { %537 = vmatprep.subr.bf16.mxu0 %v638_v27 }
  0x41   :  { %538 = vmatpush3.bf16.msra.mxu0 %v585_v51 }
  0xf7   :  { %v141_v40 = vpop.f32.mrb[0].mxu0 }
  0xf8   :  { %v142_v41 = vadd.f32 %v141_v40, %v56_v38  ;;  %v143_v42 = vpop.f32.mrb[1].mxu0 }
  0xf9   :  { %v144_v43 = vadd.f32 %v143_v42, %v60_v39  ;;  %v145_v44 = vpop.f32.mrb[2].mxu0 }
  0xfa   :  { %v148_v45 = vmax.f32 %v142_v41, 0.0  ;;  %v146_v46 = vpop.f32.mrb[3].mxu0 }
  0xfb   :  { %v149_v47 = vmax.f32 %v144_v43, 0.0 }
  0xfc   :  { %v150_v49 = vpack.c.bf16 %v148_v45, %v148_v45 }
  0xfd   :  { %v151_v48 = vpack.c.bf16 %v149_v47, %v149_v47 }
  0xff   :  { %319 = vmatprep.mubr.bf16.mxu1 %v151_v48 }
 0x100   :  { %320 = vmatmul.mubr.bf16.vlgmr.msra.gmra.mrb[0].mxu1 %v150_v49 }
 0x1d3   :  { %v508_v52 = vpop.f32.mrb[0].mxu1 }
 0x1d4   :  { %v509_v54 = vpop.f32.mrb[1].mxu1 }
 0x1d5   :  { %v510_v55 = vadd.f32 %v509_v54, %v508_v52  ;;  %v511_v56 = vpop.f32.mrb[2].mxu1 }
 0x1d6   :  { %v512_v57 = vpop.f32.mrb[3].mxu1 }
 0x1d7   :  { %v322_v58 = vadd.f32 %v510_v55, %v466_v53 }
 0x1d9   :  { %v327_v59 = vmax.f32 %v322_v58, 0.0 }
 0x1db   :  { %v328_v60 = vpack.c.bf16 %v327_v59, %v327_v59 }
 0x1dd   :  { %540 = vmatmul.mubr.bf16.vlgmr.msra.gmra.mrb[4].mxu0 %v328_v60 }
 0x2b0   :  { %v434_v62 = vpop.f32.mrb[4].mxu0 }
 0x2b1   :  { %v435_v63 = vadd.f32 %v483_v61, %v434_v62  ;;  %v541_v0 = vpop.f32.mrb[5].mxu0 }
 0x2b2   :  { %v437_v1 = vpop.f32.mrb[6].mxu0 }
 0x2b3   :  { %v542_v2 = vpop.f32.mrb[7].mxu0  ;;  %441 = vst.msk [vmem:[#allocation5] sm:$0xff] %vm440_vm2, %v435_v63 }
 0x2b4   :  { %619 = shalt.err (!%p616_p12)
}
 0x2b5   :  { %s620_s6 = scalar_lea.hbm %s772_s7, 128 }
 0x2b6   :  { %p621_p13 = scmp.ne.s32.totalorder %s772_s7, %s620_s6  ;;  %p624_p0 = scmp.lt.u32.totalorder %s620_s6, %s772_s7 }
 0x2b8   :  { %p626_p1 = pnand %p624_p0, %p621_p13 }
 0x2ba   :  { %629 = shalt.err (!%p626_p1)
}
 0x2bb   :  { %451 = dma.vmem_to_hbm [thread:$0]  %s449_s27, 128, %s772_s7, [#allocation4]  }
 0x2bc   :  { %632 = dma.done.wait [#allocation4], 128  }
 0x2bd   :  { %633 = vsyncadd [#allocation4], 4294967168 }
 0x2be   :  { %455 = vsyncpa [#allocation3], 1 }
 0x2bf   :  { %456 = vsyncpa [#allocation4], 1 }

</bundles_post_ra>
